<compile_context>
chip_gen: v7x
topology: tpu7x:2x2x1
jax: 0.10.0
libtpu: 0.0.40
codegen_flags: <defaults>
</compile_context>

<pallas_src>
import jax
import jax.numpy as jnp
from jax.experimental import pallas as pl
from jax.experimental.pallas import tpu as pltpu

LANE = 128  # pad every feature / point axis to the 128-lane vreg width


def _pad2(a, shape):
    out = jnp.zeros(shape, jnp.float32)
    return out.at[: a.shape[0], : a.shape[1]].set(a.astype(jnp.float32))


def _make_kernel(nb: int, nt: int):
    """Fused DeepONet + projection head; layer loops unrolled at trace time.

    Ref layout:
      xf_ref : [batch, 128]        branch input, zero-padded features
      xlt_ref: [128, 128]          trunk input TRANSPOSED (dim_x on sublanes,
                                   points on lanes), zero-padded
      p_ref  : [nb+nt+4, 128, 128] packed parameter slab (see pack_params)
      out_ref: [batch, 128]        lane-dense output; cols >= n_out are zero
    """
    RB_BLK = nb + nt + 2  # row-bias block   (branch biases, b1', b2)
    CB_BLK = nb + nt + 3  # trunk column-bias block

    def kernel(xf_ref, xlt_ref, p_ref, out_ref):
        RB = p_ref[RB_BLK]  # [128, 128]  row biases
        CB = p_ref[CB_BLK]  # [128, 128]  trunk biases, one column per layer

        # ---- branch net: relu between layers, none on the last ----
        h = xf_ref[...]
        for i in range(nb):
            h = jnp.dot(h, p_ref[i], preferred_element_type=jnp.float32)
            h = h + RB[i:i + 1, :]
            if i < nb - 1:
                h = jnp.maximum(h, 0.0)

        # ---- trunk net in transposed layout [H, n_points] (points on lanes);
        #      relu after every layer incl. the last (deepxde semantics) ----
        t = xlt_ref[...]
        for i in range(nt):
            t = jnp.dot(p_ref[nb + i], t, preferred_element_type=jnp.float32)
            t = jnp.maximum(t + CB[:, i:i + 1], 0.0)

        # ---- reassociated merge + projection head ----
        # (h @ t^T + b0) @ w1 + b1  ==  h @ (t^T @ w1) + b1'   (b0 folded in b1')
        w1_eff = jnp.dot(t, p_ref[nb + nt], preferred_element_type=jnp.float32)
        z = jnp.maximum(
            jnp.dot(h, w1_eff, preferred_element_type=jnp.float32)
            + RB[nb:nb + 1, :],
            0.0,
        )
        out_ref[...] = (
            jnp.dot(z, p_ref[nb + nt + 1], preferred_element_type=jnp.float32)
            + RB[nb + 1:nb + 2, :]
        )

    return kernel


def pack_params(params):
    """Pack all weights/biases into one (8,128)-aligned f32 slab."""
    bW, bB, tW, tB, b0, w1, b1, w2, b2 = params
    nb, nt = len(bW), len(tW)

    blocks = [_pad2(W, (LANE, LANE)) for W in bW]
    blocks += [_pad2(W.T, (LANE, LANE)) for W in tW]  # trunk weights pre-transposed
    blocks.append(_pad2(w1, (LANE, LANE)))
    blocks.append(_pad2(w2, (LANE, LANE)))

    # Row-bias block: branch biases in rows 0..nb-1, b1' in row nb, b2 in nb+1.
    # b0 (the DeepONetCartesianProd scalar merge bias) folded into b1'.
    b1_eff = b1 + b0[0, 0] * jnp.sum(w1, axis=0, keepdims=True)
    rb = jnp.zeros((LANE, LANE), jnp.float32)
    for i, b in enumerate(bB):
        rb = rb.at[i, : b.shape[1]].set(b[0])
    rb = rb.at[nb, : b1_eff.shape[1]].set(b1_eff[0])
    rb = rb.at[nb + 1, : b2.shape[1]].set(b2[0])
    blocks.append(rb)

    # Trunk column-bias block: bias of layer i lives in column i (H on sublanes).
    cb = jnp.zeros((LANE, LANE), jnp.float32)
    for i, b in enumerate(tB):
        cb = cb.at[: b.shape[1], i].set(b[0])
    blocks.append(cb)

    return jnp.stack(blocks, axis=0)  # [nb+nt+4, 128, 128]


def deeponet_projected_forward(x_func, x_loc, params):
    """Pallas-backed forward pass. Small shapes -> single block, everything in VMEM."""
    bW, bB, tW, tB, b0, w1, b1, w2, b2 = params
    nb, nt = len(bW), len(tW)
    batch, n_in = x_func.shape
    n_points, dim_x = x_loc.shape
    n_out = w2.shape[1]
    assert n_points == n_in, "`self.out` head requires n_points == n_input_channel"
    assert n_points <= LANE and n_in <= LANE and dim_x <= LANE
    # TODO(synk): for n_points/batch >> 128, add a grid over points/batch with
    # dimension_semantics=("parallel",) and tiled BlockSpecs instead of padding
    # to a single 128-wide block (also needed to use both v7x TensorCores).

    xf_pad = _pad2(x_func, (batch, LANE))
    xlt_pad = _pad2(x_loc.T, (LANE, LANE))  # transposed: points on lanes
    slab = pack_params(params)

    flops = 2 * LANE * LANE * (batch * nb      # branch matmuls
                               + LANE * nt     # trunk matmuls
                               + LANE          # t^T @ w1
                               + 2 * batch)    # head matmuls
    bytes_accessed = 4 * (xf_pad.size + xlt_pad.size + slab.size + batch * LANE)

    vmem = pl.BlockSpec(memory_space=pltpu.MemorySpace.VMEM)
    out_pad = pl.pallas_call(
        _make_kernel(nb, nt),
        out_shape=jax.ShapeDtypeStruct((batch, LANE), jnp.float32),
        in_specs=[vmem, vmem, vmem],
        out_specs=vmem,
        cost_estimate=pl.CostEstimate(
            flops=flops, transcendentals=0, bytes_accessed=bytes_accessed),
    )(xf_pad, xlt_pad, slab)
    return out_pad[:, :n_out]


def _reference_forward(x_func, x_loc, params):
    """Pure-JAX reference mirroring the PyTorch/deepxde semantics."""
    bW, bB, tW, tB, b0, w1, b1, w2, b2 = params
    h = x_func
    for i in range(len(bW)):
        h = h @ bW[i] + bB[i]
        if i < len(bW) - 1:
            h = jnp.maximum(h, 0.0)
    t = x_loc
    for i in range(len(tW)):
        t = jnp.maximum(t @ tW[i] + tB[i], 0.0)
    y = jnp.einsum("bi,ni->bn", h, t) + b0[0, 0]
    z = jnp.maximum(y @ w1 + b1, 0.0)
    return z @ w2 + b2


def _glorot(key, shape):
    fan_in, fan_out = shape
    std = (2.0 / (fan_in + fan_out)) ** 0.5
    return std * jax.random.normal(key, shape, dtype=jnp.float32)


def make_params(key, dim_x, hidden_size, num_layers, n_input_channel, n_output_channel):
    # branch FNN layer sizes: [n_input_channel, H, ..., H]  (num_layers entries)
    # trunk  FNN layer sizes: [dim_x,           H, ..., H]
    branch_sizes = [n_input_channel] + [hidden_size] * (num_layers - 1)
    trunk_sizes = [dim_x] + [hidden_size] * (num_layers - 1)

    keys = iter(jax.random.split(key, 64))
    bW = [_glorot(next(keys), (branch_sizes[i], branch_sizes[i + 1]))
          for i in range(len(branch_sizes) - 1)]
    bB = [jnp.zeros((1, branch_sizes[i + 1]), jnp.float32)
          for i in range(len(branch_sizes) - 1)]
    tW = [_glorot(next(keys), (trunk_sizes[i], trunk_sizes[i + 1]))
          for i in range(len(trunk_sizes) - 1)]
    tB = [jnp.zeros((1, trunk_sizes[i + 1]), jnp.float32)
          for i in range(len(trunk_sizes) - 1)]
    b0 = jnp.full((1, 1), 0.1, jnp.float32)  # DeepONetCartesianProd scalar output bias

    hid = 4 * n_output_channel
    w1 = _glorot(next(keys), (n_input_channel, hid))
    b1 = 0.01 * jax.random.normal(next(keys), (1, hid), dtype=jnp.float32)
    w2 = _glorot(next(keys), (hid, n_output_channel))
    b2 = 0.01 * jax.random.normal(next(keys), (1, n_output_channel), dtype=jnp.float32)
    return bW, bB, tW, tB, b0, w1, b1, w2, b2


if __name__ == "__main__":
    # Small shapes consistent with the module's forward.
    dim_x = 3
    hidden_size = 32
    num_layers = 3
    n_input_channel = 16
    n_output_channel = 4
    batch = 2
    n_points = n_input_channel  # required by the `self.out` head

    key = jax.random.PRNGKey(0)
    k_xf, k_xl, k_p = jax.random.split(key, 3)
    x_func = jax.random.normal(k_xf, (batch, n_input_channel), dtype=jnp.float32)
    x_loc = jax.random.normal(k_xl, (n_points, dim_x), dtype=jnp.float32)

    params = make_params(k_p, dim_x, hidden_size, num_layers,
                         n_input_channel, n_output_channel)

    out = deeponet_projected_forward(x_func, x_loc, params)
    out = jax.block_until_ready(out)

    ref = _reference_forward(x_func, x_loc, params)
    assert out.shape == (batch, n_output_channel)
    assert jnp.allclose(out, ref, atol=1e-3, rtol=1e-3), "mismatch vs JAX reference"

    print("KERNEL_OK")
</pallas_src>

<mosaic_0001>
module attributes {stable_mosaic.version = 11 : i64} {
  func.func @kernel(%arg0: memref<2x128xf32, #tpu.memory_space<vmem>>, %arg1: memref<128x128xf32, #tpu.memory_space<vmem>>, %arg2: memref<8x128x128xf32, #tpu.memory_space<vmem>>, %arg3: memref<2x128xf32, #tpu.memory_space<vmem>>) attributes {dimension_semantics = [], scalar_prefetch = 0 : i64, scratch_operands = 0 : i64, tpu.core_type = #tpu.core_type<tc>} {
    %c6 = arith.constant 6 : index
    %c0 = arith.constant 0 : index
    %c0_0 = arith.constant 0 : index
    %0 = vector.load %arg2[%c6, %c0, %c0_0] : memref<8x128x128xf32, #tpu.memory_space<vmem>>, vector<1x128x128xf32>
    %1 = vector.shape_cast %0 : vector<1x128x128xf32> to vector<128x128xf32>
    %c7 = arith.constant 7 : index
    %c0_1 = arith.constant 0 : index
    %c0_2 = arith.constant 0 : index
    %2 = vector.load %arg2[%c7, %c0_1, %c0_2] : memref<8x128x128xf32, #tpu.memory_space<vmem>>, vector<1x128x128xf32>
    %3 = vector.shape_cast %2 : vector<1x128x128xf32> to vector<128x128xf32>
    %c0_3 = arith.constant 0 : index
    %c0_4 = arith.constant 0 : index
    %4 = vector.load %arg0[%c0_3, %c0_4] : memref<2x128xf32, #tpu.memory_space<vmem>>, vector<2x128xf32>
    %c0_5 = arith.constant 0 : index
    %c0_6 = arith.constant 0 : index
    %c0_7 = arith.constant 0 : index
    %5 = vector.load %arg2[%c0_5, %c0_6, %c0_7] : memref<8x128x128xf32, #tpu.memory_space<vmem>>, vector<1x128x128xf32>
    %6 = vector.shape_cast %5 : vector<1x128x128xf32> to vector<128x128xf32>
    %cst = arith.constant dense<0.000000e+00> : vector<2x128xf32>
    %7 = tpu.matmul %4, %6, %cst {dimension_numbers = #tpu.dot_dimension_numbers<[1], [0], [0], [1], [0, 0, 1, 1], [], []>} : vector<2x128xf32>, vector<128x128xf32>, vector<2x128xf32> -> vector<2x128xf32>
    %8 = vector.extract_strided_slice %1 {offsets = [0, 0], sizes = [1, 128], strides = [1, 1]} : vector<128x128xf32> to vector<1x128xf32>
    %9 = vector.broadcast %8 : vector<1x128xf32> to vector<2x128xf32>
    %10 = arith.addf %7, %9 : vector<2x128xf32>
    %cst_8 = arith.constant 0.000000e+00 : f32
    %11 = vector.broadcast %cst_8 : f32 to vector<2x128xf32>
    %12 = arith.maximumf %10, %11 : vector<2x128xf32>
    %c1 = arith.constant 1 : index
    %c0_9 = arith.constant 0 : index
    %c0_10 = arith.constant 0 : index
    %13 = vector.load %arg2[%c1, %c0_9, %c0_10] : memref<8x128x128xf32, #tpu.memory_space<vmem>>, vector<1x128x128xf32>
    %14 = vector.shape_cast %13 : vector<1x128x128xf32> to vector<128x128xf32>
    %cst_11 = arith.constant dense<0.000000e+00> : vector<2x128xf32>
    %15 = tpu.matmul %12, %14, %cst_11 {dimension_numbers = #tpu.dot_dimension_numbers<[1], [0], [0], [1], [0, 0, 1, 1], [], []>} : vector<2x128xf32>, vector<128x128xf32>, vector<2x128xf32> -> vector<2x128xf32>
    %16 = vector.extract_strided_slice %1 {offsets = [1, 0], sizes = [1, 128], strides = [1, 1]} : vector<128x128xf32> to vector<1x128xf32>
    %17 = vector.broadcast %16 : vector<1x128xf32> to vector<2x128xf32>
    %18 = arith.addf %15, %17 : vector<2x128xf32>
    %c0_12 = arith.constant 0 : index
    %c0_13 = arith.constant 0 : index
    %19 = vector.load %arg1[%c0_12, %c0_13] : memref<128x128xf32, #tpu.memory_space<vmem>>, vector<128x128xf32>
    %c2 = arith.constant 2 : index
    %c0_14 = arith.constant 0 : index
    %c0_15 = arith.constant 0 : index
    %20 = vector.load %arg2[%c2, %c0_14, %c0_15] : memref<8x128x128xf32, #tpu.memory_space<vmem>>, vector<1x128x128xf32>
    %21 = vector.shape_cast %20 : vector<1x128x128xf32> to vector<128x128xf32>
    %cst_16 = arith.constant dense<0.000000e+00> : vector<128x128xf32>
    %22 = tpu.matmul %21, %19, %cst_16 {dimension_numbers = #tpu.dot_dimension_numbers<[1], [0], [0], [1], [0, 0, 1, 1], [], []>} : vector<128x128xf32>, vector<128x128xf32>, vector<128x128xf32> -> vector<128x128xf32>
    %23 = vector.extract_strided_slice %3 {offsets = [0, 0], sizes = [128, 1], strides = [1, 1]} : vector<128x128xf32> to vector<128x1xf32>
    %24 = vector.broadcast %23 : vector<128x1xf32> to vector<128x128xf32>
    %25 = arith.addf %22, %24 : vector<128x128xf32>
    %cst_17 = arith.constant 0.000000e+00 : f32
    %26 = vector.broadcast %cst_17 : f32 to vector<128x128xf32>
    %27 = arith.maximumf %25, %26 : vector<128x128xf32>
    %c3 = arith.constant 3 : index
    %c0_18 = arith.constant 0 : index
    %c0_19 = arith.constant 0 : index
    %28 = vector.load %arg2[%c3, %c0_18, %c0_19] : memref<8x128x128xf32, #tpu.memory_space<vmem>>, vector<1x128x128xf32>
    %29 = vector.shape_cast %28 : vector<1x128x128xf32> to vector<128x128xf32>
    %cst_20 = arith.constant dense<0.000000e+00> : vector<128x128xf32>
    %30 = tpu.matmul %29, %27, %cst_20 {dimension_numbers = #tpu.dot_dimension_numbers<[1], [0], [0], [1], [0, 0, 1, 1], [], []>} : vector<128x128xf32>, vector<128x128xf32>, vector<128x128xf32> -> vector<128x128xf32>
    %31 = vector.extract_strided_slice %3 {offsets = [0, 1], sizes = [128, 1], strides = [1, 1]} : vector<128x128xf32> to vector<128x1xf32>
    %32 = vector.broadcast %31 : vector<128x1xf32> to vector<128x128xf32>
    %33 = arith.addf %30, %32 : vector<128x128xf32>
    %cst_21 = arith.constant 0.000000e+00 : f32
    %34 = vector.broadcast %cst_21 : f32 to vector<128x128xf32>
    %35 = arith.maximumf %33, %34 : vector<128x128xf32>
    %c4 = arith.constant 4 : index
    %c0_22 = arith.constant 0 : index
    %c0_23 = arith.constant 0 : index
    %36 = vector.load %arg2[%c4, %c0_22, %c0_23] : memref<8x128x128xf32, #tpu.memory_space<vmem>>, vector<1x128x128xf32>
    %37 = vector.shape_cast %36 : vector<1x128x128xf32> to vector<128x128xf32>
    %cst_24 = arith.constant dense<0.000000e+00> : vector<128x128xf32>
    %38 = tpu.matmul %35, %37, %cst_24 {dimension_numbers = #tpu.dot_dimension_numbers<[1], [0], [0], [1], [0, 0, 1, 1], [], []>} : vector<128x128xf32>, vector<128x128xf32>, vector<128x128xf32> -> vector<128x128xf32>
    %cst_25 = arith.constant dense<0.000000e+00> : vector<2x128xf32>
    %39 = tpu.matmul %18, %38, %cst_25 {dimension_numbers = #tpu.dot_dimension_numbers<[1], [0], [0], [1], [0, 0, 1, 1], [], []>} : vector<2x128xf32>, vector<128x128xf32>, vector<2x128xf32> -> vector<2x128xf32>
    %40 = vector.extract_strided_slice %1 {offsets = [2, 0], sizes = [1, 128], strides = [1, 1]} : vector<128x128xf32> to vector<1x128xf32>
    %41 = vector.broadcast %40 : vector<1x128xf32> to vector<2x128xf32>
    %42 = arith.addf %39, %41 : vector<2x128xf32>
    %cst_26 = arith.constant 0.000000e+00 : f32
    %43 = vector.broadcast %cst_26 : f32 to vector<2x128xf32>
    %44 = arith.maximumf %42, %43 : vector<2x128xf32>
    %c5 = arith.constant 5 : index
    %c0_27 = arith.constant 0 : index
    %c0_28 = arith.constant 0 : index
    %45 = vector.load %arg2[%c5, %c0_27, %c0_28] : memref<8x128x128xf32, #tpu.memory_space<vmem>>, vector<1x128x128xf32>
    %46 = vector.shape_cast %45 : vector<1x128x128xf32> to vector<128x128xf32>
    %cst_29 = arith.constant dense<0.000000e+00> : vector<2x128xf32>
    %47 = tpu.matmul %44, %46, %cst_29 {dimension_numbers = #tpu.dot_dimension_numbers<[1], [0], [0], [1], [0, 0, 1, 1], [], []>} : vector<2x128xf32>, vector<128x128xf32>, vector<2x128xf32> -> vector<2x128xf32>
    %48 = vector.extract_strided_slice %1 {offsets = [3, 0], sizes = [1, 128], strides = [1, 1]} : vector<128x128xf32> to vector<1x128xf32>
    %49 = vector.broadcast %48 : vector<1x128xf32> to vector<2x128xf32>
    %50 = arith.addf %47, %49 : vector<2x128xf32>
    %c0_30 = arith.constant 0 : index
    %c0_31 = arith.constant 0 : index
    %51 = vector.load %arg3[%c0_30, %c0_31] : memref<2x128xf32, #tpu.memory_space<vmem>>, vector<2x128xf32>
    tpu.vector_store %arg3[%c0_30, %c0_31], %50 {strides = array<i32>} : memref<2x128xf32, #tpu.memory_space<vmem>>, vector<2x128xf32>,
    return
  }
}

</mosaic_0001>

<bundles_post_ra>
// kernel: tpu_custom_call.1
= control target key start
LH: loop header
LB: loop body
LE: loop exit
PB: predicated region body
PF: predicated region fallthrough
CT: control target
= control target key end

     0   :  { %8 = vsyncpa [#allocation3], 0  ;;  %s2094_s0 = inlined_call_operand.hbm [shape: f32[2,128], index: 0, kind: input, shape index: {}]   ;;  %s2095_s1 = inlined_call_operand.hbm [shape: f32[128,128], index: 1, kind: input, shape index: {}]   ;;  %s2096_s2 = inlined_call_operand.hbm [shape: f32[8,128,128], index: 2, kind: input, shape index: {}]   ;;  %s2097_s3 = inlined_call_operand.hbm [shape: f32[2,128], index: 3, kind: output, shape index: {}]  }
   0x1   :  { %9 = vsyncpa [#allocation6], 0 }
   0x2   :  { %10 = vsyncpa [#allocation4], 0  ;;  %s1890_s12 = smov [#allocation5]   ;;  %s1796_s16 = scalar_lea.hbm %s2095_s1, 2048 }
   0x3   :  { %s26_s13 = sshll.u32 %s1890_s12, 4  ;;  %p1797_p0 = scmp.ne.s32.totalorder %s2095_s1, %s1796_s16  ;;  %s27_s13 = int_to_ptr.vmem [resolvable:$true] %s26_s13 }
   0x4   :  { %p1800_p1 = scmp.lt.u32.totalorder %s1796_s16, %s2095_s1 }
   0x6   :  { %p1802_p2 = pnand %p1800_p1, %p1797_p0 }
   0x8   :  { %1805 = shalt.err (!%p1802_p2)
}
   0x9   :  { %s1806_s21 = scalar_lea.vmem %s27_s13, 2048  ;;  %p1811_p4 = scmp.lt.s32.totalorder %s27_s13, %s27_s13 }
   0xa   :  { %p1807_p3 = scmp.ne.s32.totalorder %s27_s13, %s1806_s21  ;;  %p1812_p5 = scmp.lt.s32.totalorder %s1806_s21, %s1806_s21 }
   0xc   :  { %p1813_p6 = por %p1812_p5, %p1811_p4 }
   0xe   :  { %p1814_p7 = pnand %p1813_p6, %p1807_p3 }
  0x10   :  { %1817 = shalt.err (!%p1814_p7)
}
  0x11   :  { %s1891_s22 = smov 128   ;;  %s1892_s23 = smov 8  }
  0x12   :  { %32 = dma.hbm_to_vmem [thread:$0]  %s2095_s1, 2048, %s27_s13, [#allocation6], %s1891_s22, %s1891_s22, %s1892_s23  }
  0x13   :  { %s1893_s26 = smov [#allocation2]   ;;  %s1894_s28 = smov [#allocation7]  }
  0x14   :  { %s17_s27 = sshll.u32 %s1893_s26, 4  ;;  %s38_s29 = sshll.u32 %s1894_s28, 4  ;;  %s18_s27 = int_to_ptr.vmem [resolvable:$true] %s17_s27  ;;  %s39_s29 = int_to_ptr.vmem [resolvable:$true] %s38_s29 }
  0x15   :  { %s1818_s5 = scalar_lea.hbm %s2094_s0, 32 }
  0x16   :  { %p1819_p8 = scmp.ne.s32.totalorder %s2094_s0, %s1818_s5  ;;  %p1822_p9 = scmp.lt.u32.totalorder %s1818_s5, %s2094_s0 }
  0x18   :  { %p1824_p10 = pnand %p1822_p9, %p1819_p8 }
  0x1a   :  { %1827 = shalt.err (!%p1824_p10)
}
  0x1b   :  { %s1828_s1 = scalar_lea.vmem %s18_s27, 32  ;;  %p1833_p12 = scmp.lt.s32.totalorder %s18_s27, %s18_s27 }
  0x1c   :  { %p1829_p11 = scmp.ne.s32.totalorder %s18_s27, %s1828_s1  ;;  %p1834_p13 = scmp.lt.s32.totalorder %s1828_s1, %s1828_s1 }
  0x1e   :  { %p1835_p0 = por %p1834_p13, %p1833_p12 }
  0x20   :  { %p1836_p1 = pnand %p1835_p0, %p1829_p11 }
  0x22   :  { %1839 = shalt.err (!%p1836_p1)
}
  0x23   :  { %20 = dma.hbm_to_vmem [thread:$0]  %s2094_s0, 32, %s18_s27, [#allocation3]  }
  0x24   :  { %s1840_s14 = scalar_lea.hbm %s2096_s2, 16384 }
  0x25   :  { %p1841_p2 = scmp.ne.s32.totalorder %s2096_s2, %s1840_s14  ;;  %p1844_p3 = scmp.lt.u32.totalorder %s1840_s14, %s2096_s2 }
  0x27   :  { %p1846_p4 = pnand %p1844_p3, %p1841_p2 }
  0x29   :  { %1849 = shalt.err (!%p1846_p4)
}
  0x2a   :  { %s1850_s19 = scalar_lea.vmem %s39_s29, 16384  ;;  %p1855_p6 = scmp.lt.s32.totalorder %s39_s29, %s39_s29 }
  0x2b   :  { %p1851_p5 = scmp.ne.s32.totalorder %s39_s29, %s1850_s19  ;;  %p1856_p7 = scmp.lt.s32.totalorder %s1850_s19, %s1850_s19 }
  0x2d   :  { %p1857_p8 = por %p1856_p7, %p1855_p6 }
  0x2f   :  { %p1858_p9 = pnand %p1857_p8, %p1851_p5 }
  0x31   :  { %1861 = shalt.err (!%p1858_p9)
}
  0x32   :  { %44 = dma.hbm_to_vmem [thread:$0]  %s2096_s2, 16384, %s39_s29, [#allocation6], %s1891_s22, %s1891_s22, %s1892_s23  }
  0x33   :  { %1884 = dma.done.wait [#allocation3], 32  }
  0x34   :  { %1885 = vsyncadd [#allocation3], 4294967264 }
  0x35   :  { %1886 = dma.done.wait [#allocation6], 18432  }
  0x36   :  { %1887 = vsyncadd [#allocation6], 4294948864  ;;  %v1895_v0 = vmov 0.0|0.0   ;;  %vm1896_vm0 = vmmov 0   ;;  %v1897_v1 = vmov 0.0   ;;  %v1898_v2 = vmov 0  }
  0x37   :  { %1589 = vmatprep.subr.bf16.mxu0 %v1895_v0  ;;  %1313 = vmatprep.mubr.msk.f32.mxu0 %vm1896_vm0, %v1897_v1  ;;  %v74_v3 = vld [vmem:[#allocation7] sm:$0xff]  ;;  %v75_v4 = vld [vmem:[#allocation7 + $0x8] sm:$0xff]  ;;  %v76_v5 = vld [vmem:[#allocation7 + $0x10] sm:$0xff]  ;;  %s1900_s2 = smov [#allocation8]  }
  0x38   :  { %1792 = vset.pattern.permute.xlu0 %v1898_v2  ;;  %1793 = vset.pattern.permute.xlu1 %v1898_v2  ;;  %v1590_v6 = vpack.c.bf16 %v75_v4, %v74_v3  ;;  %v77_v7 = vld [vmem:[#allocation7 + $0x18] sm:$0xff]  ;;  %v78_v9 = vld [vmem:[#allocation7 + $0x20] sm:$0xff]  ;;  %v79_v10 = vld [vmem:[#allocation7 + $0x28] sm:$0xff]  ;;  %s1107_s21 = sshll.u32 %s1900_s2, 4  ;;  %s1108_s21 = int_to_ptr.vmem [resolvable:$true] %s1107_s21 }
  0x39   :  { %1613 = vmatprep.subr.bf16.mxu1 %v1895_v0  ;;  %1348 = vmatprep.mubr.msk.f32.mxu1 %vm1896_vm0, %v1897_v1  ;;  %v1593_v8 = vpack.c.bf16 %v77_v7, %v76_v5  ;;  %v1596_v11 = vpack.c.bf16 %v79_v10, %v78_v9  ;;  %v80_v12 = vld [vmem:[#allocation7 + $0x30] sm:$0xff]  ;;  %v81_v13 = vld [vmem:[#allocation7 + $0x38] sm:$0xff]  ;;  %v82_v15 = vld [vmem:[#allocation7 + $0x40] sm:$0xff]  ;;  %s1862_s22 = scalar_lea.vmem %s1108_s21, 32  ;;  %p1867_p11 = scmp.lt.s32.totalorder %s1108_s21, %s1108_s21 }
  0x3a   :  { %1591 = vmatpush3.bf16.msra.mxu0 %v1590_v6  ;;  %v1599_v14 = vpack.c.bf16 %v81_v13, %v80_v12  ;;  %v83_v16 = vld [vmem:[#allocation7 + $0x48] sm:$0xff]  ;;  %v84_v18 = vld [vmem:[#allocation7 + $0x50] sm:$0xff]  ;;  %v85_v19 = vld [vmem:[#allocation7 + $0x58] sm:$0xff]  ;;  %p1863_p10 = scmp.ne.s32.totalorder %s1108_s21, %s1862_s22  ;;  %p1868_p12 = scmp.lt.s32.totalorder %s1862_s22, %s1862_s22 }
  0x3b   :  { %1592 = vmatprep.subr.bf16.mxu0 %v1895_v0  ;;  %v1602_v17 = vpack.c.bf16 %v83_v16, %v82_v15  ;;  %v1973_v20 = vld [vmem:[#allocation7 + $0x380] sm:$0xff]  ;;  %v1975_v21 = vld [vmem:[#allocation7 + $0x390] sm:$0xff]  ;;  %v1979_v22 = vld [vmem:[#allocation7 + $0x388] sm:$0xff]  ;;  %v1605_v24 = vpack.c.bf16 %v85_v19, %v84_v18 }
  0x3c   :  { %291 = vperm.xlu0 %1792, %v1973_v20   ;;  %301 = vperm.xlu1 %1793, %v1975_v21   ;;  %v1981_v23 = vld [vmem:[#allocation7 + $0x398] sm:$0xff]  ;;  %v86_v25 = vld [vmem:[#allocation7 + $0x60] sm:$0xff]  ;;  %v87_v26 = vld [vmem:[#allocation7 + $0x68] sm:$0xff]  ;;  %p1869_p13 = por %p1868_p12, %p1867_p11 }
  0x3d   :  { %v166_v27 = vld [vmem:[#allocation7 + $0x80] sm:$0xff]  ;;  %v1988_v29 = vld [vmem:[#allocation7 + $0x3a8] sm:$0xff]  ;;  %v1608_v31 = vpack.c.bf16 %v87_v26, %v86_v25  ;;  %v168_v33 = vld [vmem:[#allocation7 + $0x90] sm:$0xff] }
  0x3e   :  { %1594 = vmatpush3.bf16.msra.mxu0 %v1593_v8  ;;  %v1986_v28 = vld [vmem:[#allocation7 + $0x3a0] sm:$0xff]  ;;  %v167_v30 = vld [vmem:[#allocation7 + $0x88] sm:$0xff]  ;;  %v169_v34 = vld [vmem:[#allocation7 + $0x98] sm:$0xff]  ;;  %p1870_p0 = pnand %p1869_p13, %p1863_p10 }
  0x3f   :  { %1595 = vmatprep.subr.bf16.mxu0 %v1895_v0  ;;  %v1614_v32 = vpack.c.bf16 %v167_v30, %v166_v27  ;;  %v88_v35 = vld [vmem:[#allocation7 + $0x70] sm:$0xff]  ;;  %v89_v36 = vld [vmem:[#allocation7 + $0x78] sm:$0xff]  ;;  %v256_v37 = vld [vmem:[#allocation5] sm:$0xff]  ;;  %v1617_v41 = vpack.c.bf16 %v169_v34, %v168_v33 }
  0x40   :  { %296 = vperm.xlu0 %1792, %v1979_v22   ;;  %306 = vperm.xlu1 %1793, %v1981_v23   ;;  %v257_v38 = vld [vmem:[#allocation5 + $0x8] sm:$0xff]  ;;  %v1993_v39 = vld [vmem:[#allocation7 + $0x3b0] sm:$0xff]  ;;  %v1995_v40 = vld [vmem:[#allocation7 + $0x3b8] sm:$0xff]  ;;  %v1611_v42 = vpack.c.bf16 %v89_v36, %v88_v35 }
  0x41   :  { %1615 = vmatpush3.bf16.msra.mxu1 %v1614_v32  ;;  %v170_v43 = vld [vmem:[#allocation7 + $0xa0] sm:$0xff]  ;;  %v171_v44 = vld [vmem:[#allocation7 + $0xa8] sm:$0xff]  ;;  %v1637_v45 = vpack.c.bf16 %v257_v38, %v256_v37  ;;  %v258_v46 = vld [vmem:[#allocation5 + $0x10] sm:$0xff] }
  0x42   :  { %1597 = vmatpush3.bf16.msra.mxu0 %v1596_v11  ;;  %1616 = vmatprep.subr.bf16.mxu1 %v1895_v0  ;;  %v259_v47 = vld [vmem:[#allocation5 + $0x18] sm:$0xff]  ;;  %v2001_v48 = vld [vmem:[#allocation7 + $0x3c0] sm:$0xff]  ;;  %v2003_v49 = vld [vmem:[#allocation7 + $0x3c8] sm:$0xff]  ;;  %v1620_v50 = vpack.c.bf16 %v171_v44, %v170_v43 }
  0x43   :  { %1598 = vmatprep.subr.bf16.mxu0 %v1895_v0  ;;  %v73_v51 = vld [vmem:[#allocation2] sm:$0x3]  ;;  %v172_v52 = vld [vmem:[#allocation7 + $0xb0] sm:$0xff]  ;;  %v1641_v54 = vpack.c.bf16 %v259_v47, %v258_v46  ;;  %v273_v55 = vld [vmem:[#allocation7 + $0x100] sm:$0xff] }
  0x44   :  { %311 = vperm.xlu0 %1792, %v1986_v28   ;;  %316 = vperm.xlu1 %1793, %v1988_v29   ;;  %v173_v53 = vld [vmem:[#allocation7 + $0xb8] sm:$0xff]  ;;  %v260_v56 = vld [vmem:[#allocation5 + $0x20] sm:$0xff]  ;;  %v261_v57 = vld [vmem:[#allocation5 + $0x28] sm:$0xff] }
  0x45   :  { %1618 = vmatpush3.bf16.msra.mxu1 %v1617_v41  ;;  %v2008_v58 = vld [vmem:[#allocation7 + $0x3d0] sm:$0xff]  ;;  %v2010_v59 = vld [vmem:[#allocation7 + $0x3d8] sm:$0xff]  ;;  %v1623_v60 = vpack.c.bf16 %v173_v53, %v172_v52  ;;  %v174_v61 = vld [vmem:[#allocation7 + $0xc0] sm:$0xff]  ;;  %v1645_v63 = vpack.c.bf16 %v261_v57, %v260_v56  ;;  %v1899_v56 = vmov 1   ;;  %v90_v57 = vlaneseq }
  0x46   :  { %1600 = vmatpush3.bf16.msra.mxu0 %v1599_v14  ;;  %1619 = vmatprep.subr.bf16.mxu1 %v1895_v0  ;;  %v175_v62 = vld [vmem:[#allocation7 + $0xc8] sm:$0xff]  ;;  %v262_v2 = vld [vmem:[#allocation5 + $0x30] sm:$0xff]  ;;  %v263_v3 = vld [vmem:[#allocation5 + $0x38] sm:$0xff] }
  0x47   :  { %1601 = vmatprep.subr.bf16.mxu0 %v1895_v0  ;;  %v2015_v4 = vld [vmem:[#allocation7 + $0x3e0] sm:$0xff]  ;;  %v2017_v5 = vld [vmem:[#allocation7 + $0x3e8] sm:$0xff]  ;;  %v1626_v6 = vpack.c.bf16 %v175_v62, %v174_v61  ;;  %v176_v7 = vld [vmem:[#allocation7 + $0xd0] sm:$0xff]  ;;  %v1649_v9 = vpack.c.bf16 %v263_v3, %v262_v2 }
  0x48   :  { %321 = vperm.xlu0 %1792, %v1993_v39   ;;  %326 = vperm.xlu1 %1793, %v1995_v40   ;;  %v177_v8 = vld [vmem:[#allocation7 + $0xd8] sm:$0xff]  ;;  %v264_v10 = vld [vmem:[#allocation5 + $0x40] sm:$0xff]  ;;  %v265_v11 = vld [vmem:[#allocation5 + $0x48] sm:$0xff] }
  0x49   :  { %1621 = vmatpush3.bf16.msra.mxu1 %v1620_v50  ;;  %v2022_v12 = vld [vmem:[#allocation7 + $0x3f0] sm:$0xff]  ;;  %v2024_v13 = vld [vmem:[#allocation7 + $0x3f8] sm:$0xff]  ;;  %v1629_v14 = vpack.c.bf16 %v177_v8, %v176_v7  ;;  %v178_v15 = vld [vmem:[#allocation7 + $0xe0] sm:$0xff] }
  0x4a   :  { %1603 = vmatpush3.bf16.msra.mxu0 %v1602_v17  ;;  %1622 = vmatprep.subr.bf16.mxu1 %v1895_v0  ;;  %v179_v16 = vld [vmem:[#allocation7 + $0xe8] sm:$0xff]  ;;  %v1653_v17 = vpack.c.bf16 %v265_v11, %v264_v10  ;;  %v266_v18 = vld [vmem:[#allocation5 + $0x50] sm:$0xff]  ;;  %v267_v19 = vld [vmem:[#allocation5 + $0x58] sm:$0xff] }
  0x4b   :  { %1604 = vmatprep.subr.bf16.mxu0 %v1895_v0  ;;  %v1657_v25 = vpack.c.bf16 %v267_v19, %v266_v18  ;;  %v268_v26 = vld [vmem:[#allocation5 + $0x60] sm:$0xff]  ;;  %v269_v27 = vld [vmem:[#allocation5 + $0x68] sm:$0xff]  ;;  %v271_v32 = vld [vmem:[#allocation5 + $0x78] sm:$0xff] }
  0x4c   :  { %331 = vperm.xlu0 %1792, %v2001_v48   ;;  %336 = vperm.xlu1 %1793, %v2003_v49   ;;  %v1661_v30 = vpack.c.bf16 %v269_v27, %v268_v26  ;;  %v274_v34 = vld [vmem:[#allocation7 + $0x108] sm:$0xff]  ;;  %v275_v35 = vld [vmem:[#allocation7 + $0x110] sm:$0xff]  ;;  %v276_v36 = vld [vmem:[#allocation7 + $0x118] sm:$0xff] }
  0x4d   :  { %1624 = vmatpush3.bf16.msra.mxu1 %v1623_v60  ;;  %v277_v37 = vld [vmem:[#allocation7 + $0x120] sm:$0xff]  ;;  %v278_v38 = vld [vmem:[#allocation7 + $0x128] sm:$0xff]  ;;  %v279_v41 = vld [vmem:[#allocation7 + $0x130] sm:$0xff]  ;;  %v2039_v60 = vshrl.u32 %v90_v57, 7 }
  0x4e   :  { %1606 = vmatpush3.bf16.msra.mxu0 %v1605_v24  ;;  %1625 = vmatprep.subr.bf16.mxu1 %v1895_v0  ;;  %v1632_v24 = vpack.c.bf16 %v179_v16, %v178_v15  ;;  %v281_v43 = vld [vmem:[#allocation7 + $0x140] sm:$0xff]  ;;  %v282_v44 = vld [vmem:[#allocation7 + $0x148] sm:$0xff]  ;;  %v284_v46 = vld [vmem:[#allocation7 + $0x158] sm:$0xff] }
  0x4f   :  { %1607 = vmatprep.subr.bf16.mxu0 %v1895_v0  ;;  %v285_v47 = vld [vmem:[#allocation7 + $0x160] sm:$0xff]  ;;  %v286_v50 = vld [vmem:[#allocation7 + $0x168] sm:$0xff]  ;;  %v288_v52 = vld [vmem:[#allocation7 + $0x178] sm:$0xff] }
  0x50   :  { %341 = vperm.xlu0 %1792, %v2008_v58   ;;  %346 = vperm.xlu1 %1793, %v2010_v59   ;;  %v180_v53 = vld [vmem:[#allocation7 + $0xf0] sm:$0xff] }
  0x51   :  { %1627 = vmatpush3.bf16.msra.mxu1 %v1626_v6 }
  0x52   :  { %1609 = vmatpush3.bf16.msra.mxu0 %v1608_v31  ;;  %1628 = vmatprep.subr.bf16.mxu1 %v1895_v0  ;;  %v270_v31 = vld [vmem:[#allocation5 + $0x70] sm:$0xff] }
  0x53   :  { %1610 = vmatprep.subr.bf16.mxu0 %v1895_v0  ;;  %v1665_v33 = vpack.c.bf16 %v271_v32, %v270_v31 }
  0x54   :  { %351 = vperm.xlu0 %1792, %v2015_v4   ;;  %356 = vperm.xlu1 %1793, %v2017_v5  }
  0x55   :  { %1630 = vmatpush3.bf16.msra.mxu1 %v1629_v14 }
  0x56   :  { %1612 = vmatpush3.bf16.msra.mxu0 %v1611_v42  ;;  %1631 = vmatprep.subr.bf16.mxu1 %v1895_v0  ;;  %v280_v42 = vld [vmem:[#allocation7 + $0x138] sm:$0xff] }
  0x57   :  { %1638 = vmatprep.subr.bf16.mxu0 %v1637_v45 }
  0x58   :  { %361 = vperm.xlu0 %1792, %v2022_v12   ;;  %366 = vperm.xlu1 %1793, %v2024_v13  }
  0x59   :  { %1314 = vmatmul.mubr.f32.vlgmr.msra.gmra.mrb[0].mxu0 %v73_v51  ;;  %1633 = vmatpush3.bf16.msra.mxu1 %v1632_v24  ;;  %v287_v51 = vld [vmem:[#allocation7 + $0x170] sm:$0xff] }
  0x5a   :  { %1640 = vmatpush3.bf16.msra.mxu0 %v1637_v45  ;;  %1383 = vmatprep.mubr.f32.mxu0 %v273_v55  ;;  %v283_v45 = vld [vmem:[#allocation7 + $0x150] sm:$0xff] }
  0x5b   :  { %1642 = vmatprep.subr.bf16.mxu0 %v1641_v54  ;;  %1634 = vmatprep.subr.bf16.mxu1 %v1895_v0 }
  0x5c   :  { %1795 = vset.pattern.permute.xlu1 %v1899_v56  ;;  %1794 = vset.pattern.permute.xlu0 %v1899_v56 }
  0x5d   :  { %552 = vperm.xlu1 %1795, %v1979_v22   ;;  %548 = vperm.xlu0 %1794, %v1973_v20   ;;  %v92_v20 = vsub.s32 0, %v2039_v60 }
  0x5e   :  { %1644 = vmatpush3.bf16.msra.mxu0 %v1641_v54  ;;  %v181_v54 = vld [vmem:[#allocation7 + $0xf8] sm:$0xff] }
  0x5f   :  { %1646 = vmatprep.subr.bf16.mxu0 %v1645_v63  ;;  %v1635_v55 = vpack.c.bf16 %v181_v54, %v180_v53 }
  0x61   :  { %1636 = vmatpush3.bf16.msra.mxu1 %v1635_v55  ;;  %556 = vperm.xlu1 %1795, %v1975_v21   ;;  %v2044_v21 = vld [vmem:[#allocation7 + $0x300] sm:$0xff] }
  0x62   :  { %1648 = vmatpush3.bf16.msra.mxu0 %v1645_v63  ;;  %560 = vperm.xlu0 %1794, %v1981_v23   ;;  %v93_v22 = vrot.slane %v2044_v21, %v92_v20 }
  0x63   :  { %1650 = vmatprep.subr.bf16.mxu0 %v1649_v9 }
  0x65   :  { %564 = vperm.xlu1 %1795, %v1986_v28  }
  0x66   :  { %1652 = vmatpush3.bf16.msra.mxu0 %v1649_v9  ;;  %568 = vperm.xlu0 %1794, %v1988_v29  }
  0x67   :  { %1654 = vmatprep.subr.bf16.mxu0 %v1653_v17 }
  0x69   :  { %572 = vperm.xlu1 %1795, %v1993_v39  }
  0x6a   :  { %1656 = vmatpush3.bf16.msra.mxu0 %v1653_v17  ;;  %576 = vperm.xlu0 %1794, %v1995_v40   ;;  %v531_v40 = vld [vmem:[#allocation7 + $0x180] sm:$0xff] }
  0x6b   :  { %1658 = vmatprep.subr.bf16.mxu0 %v1657_v25 }
  0x6d   :  { %580 = vperm.xlu1 %1795, %v2001_v48  }
  0x6e   :  { %1660 = vmatpush3.bf16.msra.mxu0 %v1657_v25  ;;  %584 = vperm.xlu0 %1794, %v2003_v49  }
  0x6f   :  { %1662 = vmatprep.subr.bf16.mxu0 %v1661_v30 }
  0x71   :  { %588 = vperm.xlu1 %1795, %v2008_v58  }
  0x72   :  { %1664 = vmatpush3.bf16.msra.mxu0 %v1661_v30  ;;  %592 = vperm.xlu0 %1794, %v2010_v59  }
  0x73   :  { %1666 = vmatprep.subr.bf16.mxu0 %v1665_v33 }
  0x75   :  { %596 = vperm.xlu1 %1795, %v2015_v4  }
  0x76   :  { %1668 = vmatpush3.bf16.msra.mxu0 %v1665_v33  ;;  %600 = vperm.xlu0 %1794, %v2017_v5  }
  0x79   :  { %1384 = vmatmul.mubr.f32.vlgmr.msra.gmra.mrb[2].mxu0 %v274_v34  ;;  %604 = vperm.xlu1 %1795, %v2022_v12  }
  0x7a   :  { %1386 = vmatprep.mubr.f32.mxu0 %v275_v35  ;;  %608 = vperm.xlu0 %1794, %v2024_v13  }
  0x7d   :  { %1387 = vmatmul.mubr.f32.gmra.mrb[4].mxu0 %v276_v36 }
  0x7e   :  { %1389 = vmatprep.mubr.f32.mxu0 %v277_v37 }
  0x81   :  { %1390 = vmatmul.mubr.f32.gmra.mrb[6].mxu0 %v278_v38 }
  0x82   :  { %1392 = vmatprep.mubr.f32.mxu0 %v279_v41 }
  0x85   :  { %1393 = vmatmul.mubr.f32.gmra.mrb[8].mxu0 %v280_v42 }
  0x86   :  { %1395 = vmatprep.mubr.f32.mxu0 %v281_v43 }
  0x89   :  { %1396 = vmatmul.mubr.f32.gmra.mrb[10].mxu0 %v282_v44 }
  0x8a   :  { %1398 = vmatprep.mubr.f32.mxu0 %v283_v45 }
  0x8d   :  { %1399 = vmatmul.mubr.f32.gmra.mrb[12].mxu0 %v284_v46 }
  0x8e   :  { %1401 = vmatprep.mubr.f32.mxu0 %v285_v47 }
  0x91   :  { %1402 = vmatmul.mubr.f32.gmra.mrb[14].mxu0 %v286_v50 }
  0x92   :  { %1404 = vmatprep.mubr.f32.mxu0 %v287_v51 }
  0x95   :  { %1405 = vmatmul.mubr.f32.gmra.mrb[16].mxu0 %v288_v52 }
  0xbb   :  { %v302_v48 = vpop.permute.xlu1 %301  ;;  %v292_v49 = vpop.permute.xlu0 %291 }
  0xbf   :  { %v307_v58 = vpop.permute.xlu1 %306  ;;  %v297_v59 = vpop.permute.xlu0 %296 }
  0xc3   :  { %v317_v61 = vpop.permute.xlu1 %316  ;;  %v312_v62 = vpop.permute.xlu0 %311 }
  0xc7   :  { %v327_v6 = vpop.permute.xlu1 %326  ;;  %v322_v9 = vpop.permute.xlu0 %321 }
  0xcb   :  { %v337_v19 = vpop.permute.xlu1 %336  ;;  %v332_v26 = vpop.permute.xlu0 %331 }
  0xcf   :  { %v347_v37 = vpop.permute.xlu1 %346  ;;  %v342_v42 = vpop.permute.xlu0 %341 }
  0xd3   :  { %v357_v54 = vpop.permute.xlu1 %356  ;;  %v352_v57 = vpop.permute.xlu0 %351 }
 0x12c   :  { %v160_v23 = vpop.f32.mrb[0].mxu0 }
 0x12d   :  { %v161_v28 = vadd.f32 %v160_v23, %v93_v22  ;;  %v1315_v29 = vpop.f32.mrb[1].mxu0 }
 0x12f   :  { %v164_v39 = vmax.f32 %v161_v28, 0.0 }
 0x131   :  { %1349 = vmatmul.mubr.f32.vlgmr.msra.gmra.mrb[0].mxu1 %v164_v39 }
 0x132   :  { %1439 = vmatprep.mubr.f32.mxu1 %v531_v40 }
 0x14c   :  { %v1385_v63 = vpop.f32.mrb[2].mxu0 }
 0x14d   :  { %v441_v2 = vadd.f32 %v1385_v63, %v297_v59  ;;  %v435_v3 = vpop.f32.mrb[3].mxu0 }
 0x14e   :  { %v436_v4 = vadd.f32 %v435_v3, %v292_v49  ;;  %v367_v49 = vpop.permute.xlu1 %366 }
 0x14f   :  { %v515_v5 = vmax.f32 %v441_v2, 0.0 }
 0x150   :  { %v514_v7 = vmax.f32 %v436_v4, 0.0  ;;  %v1388_v8 = vpop.f32.mrb[4].mxu0 }
 0x151   :  { %v451_v10 = vadd.f32 %v1388_v8, %v307_v58  ;;  %v445_v11 = vpop.f32.mrb[5].mxu0  ;;  %v533_v8 = vld [vmem:[#allocation7 + $0x190] sm:$0xff] }
 0x152   :  { %v1669_v12 = vpack.c.bf16 %v515_v5, %v514_v7  ;;  %v446_v13 = vadd.f32 %v445_v11, %v302_v48  ;;  %v532_v7 = vld [vmem:[#allocation7 + $0x188] sm:$0xff] }
 0x153   :  { %v517_v14 = vmax.f32 %v451_v10, 0.0  ;;  %v535_v10 = vld [vmem:[#allocation7 + $0x1a0] sm:$0xff]  ;;  %v536_v11 = vld [vmem:[#allocation7 + $0x1a8] sm:$0xff] }
 0x154   :  { %v516_v15 = vmax.f32 %v446_v13, 0.0  ;;  %v1391_v16 = vpop.f32.mrb[6].mxu0  ;;  %1670 = vmatprep.subr.bf16.mxu1 %v1669_v12  ;;  %v538_v13 = vld [vmem:[#allocation7 + $0x1b8] sm:$0xff] }
 0x155   :  { %v461_v17 = vadd.f32 %v1391_v16, %v317_v61  ;;  %v455_v18 = vpop.f32.mrb[7].mxu0  ;;  %1672 = vmatpush3.bf16.msra.mxu1 %v1669_v12  ;;  %v362_v61 = vpop.permute.xlu0 %361  ;;  %v537_v12 = vld [vmem:[#allocation7 + $0x1b0] sm:$0xff] }
 0x156   :  { %v1673_v24 = vpack.c.bf16 %v517_v14, %v516_v15  ;;  %v456_v25 = vadd.f32 %v455_v18, %v312_v62  ;;  %v539_v14 = vld [vmem:[#allocation7 + $0x1c0] sm:$0xff]  ;;  %v540_v15 = vld [vmem:[#allocation7 + $0x1c8] sm:$0xff]  ;;  %v541_v16 = vld [vmem:[#allocation7 + $0x1d0] sm:$0xff] }
 0x157   :  { %v519_v27 = vmax.f32 %v461_v17, 0.0  ;;  %v542_v17 = vld [vmem:[#allocation7 + $0x1d8] sm:$0xff]  ;;  %v773_v18 = vld [vmem:[#allocation7 + $0x200] sm:$0xff] }
 0x158   :  { %v518_v30 = vmax.f32 %v456_v25, 0.0  ;;  %v1394_v31 = vpop.f32.mrb[8].mxu0  ;;  %1674 = vmatprep.subr.bf16.mxu1 %v1673_v24  ;;  %v543_v25 = vld [vmem:[#allocation7 + $0x1e0] sm:$0xff] }
 0x159   :  { %v471_v32 = vadd.f32 %v1394_v31, %v327_v6  ;;  %v465_v33 = vpop.f32.mrb[9].mxu0  ;;  %1676 = vmatpush3.bf16.msra.mxu1 %v1673_v24  ;;  %v775_v24 = vld [vmem:[#allocation7 + $0x210] sm:$0xff]  ;;  %v777_v31 = vld [vmem:[#allocation7 + $0x220] sm:$0xff] }
 0x15a   :  { %v1677_v34 = vpack.c.bf16 %v519_v27, %v518_v30  ;;  %v466_v35 = vadd.f32 %v465_v33, %v322_v9  ;;  %v534_v9 = vld [vmem:[#allocation7 + $0x198] sm:$0xff]  ;;  %v544_v33 = vld [vmem:[#allocation7 + $0x1e8] sm:$0xff] }
 0x15b   :  { %v521_v36 = vmax.f32 %v471_v32, 0.0  ;;  %v776_v27 = vld [vmem:[#allocation7 + $0x218] sm:$0xff]  ;;  %v778_v32 = vld [vmem:[#allocation7 + $0x228] sm:$0xff] }
 0x15c   :  { %v520_v38 = vmax.f32 %v466_v35, 0.0  ;;  %v1397_v41 = vpop.f32.mrb[10].mxu0  ;;  %1678 = vmatprep.subr.bf16.mxu1 %v1677_v34  ;;  %v1705_v30 = vpack.c.bf16 %v776_v27, %v775_v24  ;;  %v1709_v35 = vpack.c.bf16 %v778_v32, %v777_v31 }
 0x15d   :  { %v481_v43 = vadd.f32 %v1397_v41, %v337_v19  ;;  %v475_v44 = vpop.f32.mrb[11].mxu0  ;;  %1680 = vmatpush3.bf16.msra.mxu1 %v1677_v34  ;;  %v774_v19 = vld [vmem:[#allocation7 + $0x208] sm:$0xff]  ;;  %v545_v34 = vld [vmem:[#allocation7 + $0x1f0] sm:$0xff] }
 0x15e   :  { %v1681_v45 = vpack.c.bf16 %v521_v36, %v520_v38  ;;  %v476_v46 = vadd.f32 %v475_v44, %v332_v26  ;;  %v1701_v26 = vpack.c.bf16 %v774_v19, %v773_v18  ;;  %v779_v36 = vld [vmem:[#allocation7 + $0x230] sm:$0xff]  ;;  %v546_v38 = vld [vmem:[#allocation7 + $0x1f8] sm:$0xff] }
 0x15f   :  { %v523_v47 = vmax.f32 %v481_v43, 0.0  ;;  %v782_v43 = vld [vmem:[#allocation7 + $0x248] sm:$0xff] }
 0x160   :  { %v522_v50 = vmax.f32 %v476_v46, 0.0  ;;  %v1400_v51 = vpop.f32.mrb[12].mxu0  ;;  %1682 = vmatprep.subr.bf16.mxu1 %v1681_v45  ;;  %1702 = vmatprep.subr.bf16.mxu0 %v1701_v26  ;;  %v784_v46 = vld [vmem:[#allocation7 + $0x258] sm:$0xff] }
 0x161   :  { %v491_v52 = vadd.f32 %v1400_v51, %v347_v37  ;;  %v485_v53 = vpop.f32.mrb[13].mxu0  ;;  %1684 = vmatpush3.bf16.msra.mxu1 %v1681_v45  ;;  %1704 = vmatpush3.bf16.msra.mxu0 %v1701_v26  ;;  %v780_v37 = vld [vmem:[#allocation7 + $0x238] sm:$0xff]  ;;  %v783_v45 = vld [vmem:[#allocation7 + $0x250] sm:$0xff]  ;;  %v786_v51 = vld [vmem:[#allocation7 + $0x268] sm:$0xff] }
 0x162   :  { %v1685_v55 = vpack.c.bf16 %v523_v47, %v522_v50  ;;  %v486_v56 = vadd.f32 %v485_v53, %v342_v42  ;;  %1706 = vmatprep.subr.bf16.mxu0 %v1705_v30  ;;  %v1713_v41 = vpack.c.bf16 %v780_v37, %v779_v36  ;;  %v781_v42 = vld [vmem:[#allocation7 + $0x240] sm:$0xff]  ;;  %v1721_v47 = vpack.c.bf16 %v784_v46, %v783_v45  ;;  %v787_v53 = vld [vmem:[#allocation7 + $0x270] sm:$0xff] }
 0x163   :  { %v525_v20 = vmax.f32 %v491_v52, 0.0  ;;  %v1717_v44 = vpack.c.bf16 %v782_v43, %v781_v42  ;;  %v785_v50 = vld [vmem:[#allocation7 + $0x260] sm:$0xff] }
 0x164   :  { %v524_v22 = vmax.f32 %v486_v56, 0.0  ;;  %v1403_v23 = vpop.f32.mrb[14].mxu0  ;;  %1686 = vmatprep.subr.bf16.mxu1 %v1685_v55  ;;  %v1725_v52 = vpack.c.bf16 %v786_v51, %v785_v50 }
 0x165   :  { %v501_v28 = vadd.f32 %v1403_v23, %v357_v54  ;;  %v495_v29 = vpop.f32.mrb[15].mxu0  ;;  %1688 = vmatpush3.bf16.msra.mxu1 %v1685_v55  ;;  %1708 = vmatpush3.bf16.msra.mxu0 %v1705_v30  ;;  %v788_v54 = vld [vmem:[#allocation7 + $0x278] sm:$0xff] }
 0x166   :  { %v1689_v39 = vpack.c.bf16 %v525_v20, %v524_v22  ;;  %v496_v40 = vadd.f32 %v495_v29, %v352_v57  ;;  %1710 = vmatprep.subr.bf16.mxu0 %v1709_v35  ;;  %v1729_v55 = vpack.c.bf16 %v788_v54, %v787_v53  ;;  %v549_v20 = vpop.permute.xlu0 %548  ;;  %v553_v22 = vpop.permute.xlu1 %552 }
 0x167   :  { %v527_v48 = vmax.f32 %v501_v28, 0.0 }
 0x168   :  { %v526_v58 = vmax.f32 %v496_v40, 0.0  ;;  %v1406_v59 = vpop.f32.mrb[16].mxu0  ;;  %1690 = vmatprep.subr.bf16.mxu1 %v1689_v39 }
 0x169   :  { %v511_v62 = vadd.f32 %v1406_v59, %v367_v49  ;;  %v505_v63 = vpop.f32.mrb[17].mxu0  ;;  %1692 = vmatpush3.bf16.msra.mxu1 %v1689_v39  ;;  %1712 = vmatpush3.bf16.msra.mxu0 %v1709_v35 }
 0x16a   :  { %v1693_v2 = vpack.c.bf16 %v527_v48, %v526_v58  ;;  %v506_v3 = vadd.f32 %v505_v63, %v362_v61  ;;  %1714 = vmatprep.subr.bf16.mxu0 %v1713_v41  ;;  %v561_v23 = vpop.permute.xlu0 %560  ;;  %v557_v28 = vpop.permute.xlu1 %556 }
 0x16b   :  { %v529_v4 = vmax.f32 %v511_v62, 0.0 }
 0x16c   :  { %v528_v5 = vmax.f32 %v506_v3, 0.0  ;;  %1694 = vmatprep.subr.bf16.mxu1 %v1693_v2 }
 0x16d   :  { %1696 = vmatpush3.bf16.msra.mxu1 %v1693_v2  ;;  %1716 = vmatpush3.bf16.msra.mxu0 %v1713_v41 }
 0x16e   :  { %v1697_v6 = vpack.c.bf16 %v529_v4, %v528_v5  ;;  %1718 = vmatprep.subr.bf16.mxu0 %v1717_v44  ;;  %v569_v29 = vpop.permute.xlu0 %568  ;;  %v565_v39 = vpop.permute.xlu1 %564 }
 0x170   :  { %1698 = vmatprep.subr.bf16.mxu1 %v1697_v6 }
 0x171   :  { %1700 = vmatpush3.bf16.msra.mxu1 %v1697_v6  ;;  %1720 = vmatpush3.bf16.msra.mxu0 %v1717_v44 }
 0x172   :  { %1733 = vmatprep.subr.bf16.mxu1 %v1895_v0  ;;  %1722 = vmatprep.subr.bf16.mxu0 %v1721_v47  ;;  %v577_v59 = vpop.permute.xlu0 %576  ;;  %v573_v63 = vpop.permute.xlu1 %572 }
 0x174   :  { %1440 = vmatmul.mubr.f32.vlgmr.msra.gmra.mrb[2].mxu1 %v532_v7 }
 0x175   :  { %1442 = vmatprep.mubr.f32.mxu1 %v533_v8  ;;  %1724 = vmatpush3.bf16.msra.mxu0 %v1721_v47 }
 0x176   :  { %1726 = vmatprep.subr.bf16.mxu0 %v1725_v52 }
 0x178   :  { %1443 = vmatmul.mubr.f32.gmra.mrb[4].mxu1 %v534_v9 }
 0x179   :  { %1445 = vmatprep.mubr.f32.mxu1 %v535_v10  ;;  %1728 = vmatpush3.bf16.msra.mxu0 %v1725_v52 }
 0x17a   :  { %1730 = vmatprep.subr.bf16.mxu0 %v1729_v55 }
 0x17c   :  { %1446 = vmatmul.mubr.f32.gmra.mrb[6].mxu1 %v536_v11  ;;  %v585_v11 = vpop.permute.xlu0 %584 }
 0x17d   :  { %1448 = vmatprep.mubr.f32.mxu1 %v537_v12  ;;  %1732 = vmatpush3.bf16.msra.mxu0 %v1729_v55 }
 0x17e   :  { %1757 = vmatprep.subr.bf16.mxu0 %v1895_v0 }
 0x180   :  { %1449 = vmatmul.mubr.f32.gmra.mrb[8].mxu1 %v538_v13  ;;  %v581_v13 = vpop.permute.xlu1 %580  ;;  %v593_v24 = vpop.permute.xlu0 %592 }
 0x181   :  { %1451 = vmatprep.mubr.f32.mxu1 %v539_v14 }
 0x184   :  { %1452 = vmatmul.mubr.f32.gmra.mrb[10].mxu1 %v540_v15  ;;  %v589_v27 = vpop.permute.xlu1 %588  ;;  %v601_v41 = vpop.permute.xlu0 %600 }
 0x185   :  { %1454 = vmatprep.mubr.f32.mxu1 %v541_v16 }
 0x188   :  { %1455 = vmatmul.mubr.f32.gmra.mrb[12].mxu1 %v542_v17  ;;  %v597_v43 = vpop.permute.xlu1 %596  ;;  %v609_v52 = vpop.permute.xlu0 %608 }
 0x189   :  { %1457 = vmatprep.mubr.f32.mxu1 %v543_v25 }
 0x18c   :  { %1458 = vmatmul.mubr.f32.gmra.mrb[14].mxu1 %v544_v33  ;;  %v605_v55 = vpop.permute.xlu1 %604 }
 0x18d   :  { %1460 = vmatprep.mubr.f32.mxu1 %v545_v34 }
 0x190   :  { %1461 = vmatmul.mubr.f32.gmra.mrb[16].mxu1 %v546_v38 }
 0x191   :  { %1551 = vmatprep.mubr.msk.f32.mxu1 %vm1896_vm0, %v1897_v1 }
 0x204   :  { %v2057_v56 = vpop.f32.mrb[0].mxu1 }
 0x205   :  { %v1350_v57 = vpop.f32.mrb[1].mxu1 }
 0x247   :  { %v1441_v40 = vpop.f32.mrb[2].mxu1 }
 0x248   :  { %v683_v48 = vadd.f32 %v1441_v40, %v553_v22  ;;  %v677_v49 = vpop.f32.mrb[3].mxu1  ;;  %v1011_v40 = vld [vmem:[#allocation7 + $0x288] sm:$0xff] }
 0x249   :  { %v678_v58 = vadd.f32 %v677_v49, %v549_v20 }
 0x24a   :  { %v757_v2 = vmax.f32 %v683_v48, 0.0  ;;  %v1012_v48 = vld [vmem:[#allocation7 + $0x290] sm:$0xff] }
 0x24b   :  { %v756_v61 = vmax.f32 %v678_v58, 0.0  ;;  %v1444_v62 = vpop.f32.mrb[4].mxu1  ;;  %v1013_v58 = vld [vmem:[#allocation7 + $0x298] sm:$0xff] }
 0x24c   :  { %v693_v3 = vadd.f32 %v1444_v62, %v561_v23  ;;  %v687_v4 = vpop.f32.mrb[5].mxu1  ;;  %v1015_v62 = vld [vmem:[#allocation7 + $0x2a8] sm:$0xff] }
 0x24d   :  { %v688_v5 = vadd.f32 %v687_v4, %v557_v28  ;;  %1495 = vmatprep.mubr.f32.mxu0 %v756_v61  ;;  %v1014_v61 = vld [vmem:[#allocation7 + $0x2a0] sm:$0xff] }
 0x24e   :  { %1496 = vmatmul.mubr.f32.vlgmr.msra.gmra.mrb[18].mxu0 %v757_v2  ;;  %v759_v8 = vmax.f32 %v693_v3, 0.0  ;;  %v1016_v2 = vld [vmem:[#allocation7 + $0x2b0] sm:$0xff]  ;;  %v1017_v3 = vld [vmem:[#allocation7 + $0x2b8] sm:$0xff] }
 0x24f   :  { %v758_v6 = vmax.f32 %v688_v5, 0.0  ;;  %v1447_v7 = vpop.f32.mrb[6].mxu1  ;;  %v1767_v4 = vpack.c.bf16 %v1017_v3, %v1016_v2  ;;  %v1019_v5 = vld [vmem:[#allocation7 + $0x2c8] sm:$0xff] }
 0x250   :  { %v703_v9 = vadd.f32 %v1447_v7, %v569_v29  ;;  %v697_v10 = vpop.f32.mrb[7].mxu1  ;;  %v1020_v7 = vld [vmem:[#allocation7 + $0x2d0] sm:$0xff] }
 0x251   :  { %v698_v12 = vadd.f32 %v697_v10, %v565_v39  ;;  %1498 = vmatprep.mubr.f32.mxu0 %v758_v6  ;;  %v1010_v39 = vld [vmem:[#allocation7 + $0x280] sm:$0xff] }
 0x252   :  { %1499 = vmatmul.mubr.f32.gmra.mrb[20].mxu0 %v759_v8  ;;  %v761_v16 = vmax.f32 %v703_v9, 0.0  ;;  %v1758_v49 = vpack.c.bf16 %v1011_v40, %v1010_v39  ;;  %v1021_v8 = vld [vmem:[#allocation7 + $0x2d8] sm:$0xff]  ;;  %v1022_v10 = vld [vmem:[#allocation7 + $0x2e0] sm:$0xff] }
 0x253   :  { %v760_v14 = vmax.f32 %v698_v12, 0.0  ;;  %v1450_v15 = vpop.f32.mrb[8].mxu1  ;;  %v1773_v9 = vpack.c.bf16 %v1021_v8, %v1020_v7 }
 0x254   :  { %v713_v17 = vadd.f32 %v1450_v15, %v577_v59  ;;  %v707_v18 = vpop.f32.mrb[9].mxu1  ;;  %1759 = vmatpush3.bf16.msra.mxu0 %v1758_v49  ;;  %v1761_v59 = vpack.c.bf16 %v1013_v58, %v1012_v48 }
 0x255   :  { %v708_v19 = vadd.f32 %v707_v18, %v573_v63  ;;  %1501 = vmatprep.mubr.f32.mxu0 %v760_v14  ;;  %1760 = vmatprep.subr.bf16.mxu0 %v1895_v0  ;;  %v1764_v63 = vpack.c.bf16 %v1015_v62, %v1014_v61 }
 0x256   :  { %1502 = vmatmul.mubr.f32.gmra.mrb[22].mxu0 %v761_v16  ;;  %v763_v30 = vmax.f32 %v713_v17, 0.0 }
 0x257   :  { %v762_v25 = vmax.f32 %v708_v19, 0.0  ;;  %v1453_v26 = vpop.f32.mrb[10].mxu1 }
 0x258   :  { %v723_v31 = vadd.f32 %v1453_v26, %v585_v11  ;;  %v717_v32 = vpop.f32.mrb[11].mxu1  ;;  %1762 = vmatpush3.bf16.msra.mxu0 %v1761_v59  ;;  %v1023_v11 = vld [vmem:[#allocation7 + $0x2e8] sm:$0xff] }
 0x259   :  { %v718_v33 = vadd.f32 %v717_v32, %v581_v13  ;;  %1504 = vmatprep.mubr.f32.mxu0 %v762_v25  ;;  %1763 = vmatprep.subr.bf16.mxu0 %v1895_v0  ;;  %v1776_v12 = vpack.c.bf16 %v1023_v11, %v1022_v10 }
 0x25a   :  { %1505 = vmatmul.mubr.f32.gmra.mrb[24].mxu0 %v763_v30  ;;  %v765_v36 = vmax.f32 %v723_v31, 0.0 }
 0x25b   :  { %v764_v34 = vmax.f32 %v718_v33, 0.0  ;;  %v1456_v35 = vpop.f32.mrb[12].mxu1 }
 0x25c   :  { %v733_v37 = vadd.f32 %v1456_v35, %v593_v24  ;;  %v727_v38 = vpop.f32.mrb[13].mxu1  ;;  %1765 = vmatpush3.bf16.msra.mxu0 %v1764_v63 }
 0x25d   :  { %v728_v42 = vadd.f32 %v727_v38, %v589_v27  ;;  %1507 = vmatprep.mubr.f32.mxu0 %v764_v34  ;;  %1766 = vmatprep.subr.bf16.mxu0 %v1895_v0  ;;  %v184_v38 = vsub.s32 1, %v2039_v60 }
 0x25e   :  { %1508 = vmatmul.mubr.f32.gmra.mrb[26].mxu0 %v765_v36  ;;  %v767_v46 = vmax.f32 %v733_v37, 0.0 }
 0x25f   :  { %v766_v44 = vmax.f32 %v728_v42, 0.0  ;;  %v1459_v45 = vpop.f32.mrb[14].mxu1 }
 0x260   :  { %v743_v47 = vadd.f32 %v1459_v45, %v601_v41  ;;  %v737_v50 = vpop.f32.mrb[15].mxu1  ;;  %1768 = vmatpush3.bf16.msra.mxu0 %v1767_v4 }
 0x261   :  { %v738_v51 = vadd.f32 %v737_v50, %v597_v43  ;;  %1510 = vmatprep.mubr.f32.mxu0 %v766_v44  ;;  %1769 = vmatprep.subr.bf16.mxu0 %v1895_v0  ;;  %v185_v44 = vrot.slane %v2044_v21, %v184_v38  ;;  %v1024_v50 = vld [vmem:[#allocation7 + $0x2f0] sm:$0xff] }
 0x262   :  { %1511 = vmatmul.mubr.f32.gmra.mrb[28].mxu0 %v767_v46  ;;  %v769_v57 = vmax.f32 %v743_v47, 0.0 }
 0x263   :  { %v768_v53 = vmax.f32 %v738_v51, 0.0  ;;  %v1462_v54 = vpop.f32.mrb[16].mxu1  ;;  %v253_v47 = vadd.f32 %v2057_v56, %v185_v44  ;;  %v1025_v51 = vld [vmem:[#allocation7 + $0x2f8] sm:$0xff] }
 0x264   :  { %v753_v20 = vadd.f32 %v1462_v54, %v609_v52  ;;  %v747_v22 = vpop.f32.mrb[17].mxu1  ;;  %v1779_v52 = vpack.c.bf16 %v1025_v51, %v1024_v50 }
 0x265   :  { %v748_v23 = vadd.f32 %v747_v22, %v605_v55  ;;  %1513 = vmatprep.mubr.f32.mxu0 %v768_v53  ;;  %v936_v53 = vsub.s32 2, %v2039_v60 }
 0x266   :  { %1514 = vmatmul.mubr.f32.gmra.mrb[30].mxu0 %v769_v57  ;;  %v771_v29 = vmax.f32 %v753_v20, 0.0 }
 0x267   :  { %v770_v28 = vmax.f32 %v748_v23, 0.0  ;;  %v937_v54 = vrot.slane %v2044_v21, %v936_v53 }
 0x269   :  { %1516 = vmatprep.mubr.f32.mxu0 %v770_v28 }
 0x26a   :  { %1517 = vmatmul.mubr.f32.gmra.mrb[32].mxu0 %v771_v29 }
 0x26b   :  { %1586 = vmatprep.mubr.msk.f32.mxu0 %vm1896_vm0, %v1897_v1  ;;  %v1018_v1 = vld [vmem:[#allocation7 + $0x2c0] sm:$0xff] }
 0x26c   :  { %v1770_v6 = vpack.c.bf16 %v1019_v5, %v1018_v1 }
 0x26e   :  { %1771 = vmatpush3.bf16.msra.mxu0 %v1770_v6 }
 0x26f   :  { %1772 = vmatprep.subr.bf16.mxu0 %v1895_v0 }
 0x272   :  { %1774 = vmatpush3.bf16.msra.mxu0 %v1773_v9 }
 0x273   :  { %1775 = vmatprep.subr.bf16.mxu0 %v1895_v0 }
 0x276   :  { %1777 = vmatpush3.bf16.msra.mxu0 %v1776_v12 }
 0x277   :  { %1778 = vmatprep.subr.bf16.mxu0 %v1895_v0 }
 0x27a   :  { %1780 = vmatpush3.bf16.msra.mxu0 %v1779_v52 }
 0x321   :  { %v1497_v13 = vpop.f32.mrb[18].mxu0 }
 0x322   :  { %v855_v14 = vpop.f32.mrb[19].mxu0 }
 0x323   :  { %v1734_v15 = vpack.c.bf16 %v1497_v13, %v855_v14 }
 0x325   :  { %v1500_v16 = vpop.f32.mrb[20].mxu0  ;;  %1735 = vmatpush3.bf16.msra.mxu1 %v1734_v15 }
 0x326   :  { %v865_v17 = vpop.f32.mrb[21].mxu0  ;;  %1736 = vmatprep.subr.bf16.mxu1 %v1895_v0 }
 0x327   :  { %v1737_v18 = vpack.c.bf16 %v1500_v16, %v865_v17 }
 0x329   :  { %v1503_v19 = vpop.f32.mrb[22].mxu0  ;;  %1738 = vmatpush3.bf16.msra.mxu1 %v1737_v18 }
 0x32a   :  { %v875_v24 = vpop.f32.mrb[23].mxu0  ;;  %1739 = vmatprep.subr.bf16.mxu1 %v1895_v0 }
 0x32b   :  { %v1740_v25 = vpack.c.bf16 %v1503_v19, %v875_v24 }
 0x32d   :  { %v1506_v26 = vpop.f32.mrb[24].mxu0  ;;  %1741 = vmatpush3.bf16.msra.mxu1 %v1740_v25 }
 0x32e   :  { %v885_v27 = vpop.f32.mrb[25].mxu0  ;;  %1742 = vmatprep.subr.bf16.mxu1 %v1895_v0 }
 0x32f   :  { %v1743_v30 = vpack.c.bf16 %v1506_v26, %v885_v27 }
 0x331   :  { %v1509_v31 = vpop.f32.mrb[26].mxu0  ;;  %1744 = vmatpush3.bf16.msra.mxu1 %v1743_v30 }
 0x332   :  { %v895_v32 = vpop.f32.mrb[27].mxu0  ;;  %1745 = vmatprep.subr.bf16.mxu1 %v1895_v0 }
 0x333   :  { %v1746_v33 = vpack.c.bf16 %v1509_v31, %v895_v32 }
 0x335   :  { %v1512_v34 = vpop.f32.mrb[28].mxu0  ;;  %1747 = vmatpush3.bf16.msra.mxu1 %v1746_v33 }
 0x336   :  { %v905_v35 = vpop.f32.mrb[29].mxu0  ;;  %1748 = vmatprep.subr.bf16.mxu1 %v1895_v0 }
 0x337   :  { %v1749_v36 = vpack.c.bf16 %v1512_v34, %v905_v35 }
 0x339   :  { %v1515_v37 = vpop.f32.mrb[30].mxu0  ;;  %1750 = vmatpush3.bf16.msra.mxu1 %v1749_v36 }
 0x33a   :  { %v915_v41 = vpop.f32.mrb[31].mxu0  ;;  %1751 = vmatprep.subr.bf16.mxu1 %v1895_v0 }
 0x33b   :  { %v1752_v42 = vpack.c.bf16 %v1515_v37, %v915_v41 }
 0x33d   :  { %v1518_v43 = vpop.f32.mrb[32].mxu0  ;;  %1753 = vmatpush3.bf16.msra.mxu1 %v1752_v42 }
 0x33e   :  { %v925_v45 = vpop.f32.mrb[33].mxu0  ;;  %1754 = vmatprep.subr.bf16.mxu1 %v1895_v0  ;;  %v1028_v0 = vsub.s32 3, %v2039_v60 }
 0x33f   :  { %v1755_v46 = vpack.c.bf16 %v1518_v43, %v925_v45 }
 0x340   :  { %v1029_v23 = vrot.slane %v2044_v21, %v1028_v0 }
 0x341   :  { %1756 = vmatpush3.bf16.msra.mxu1 %v1755_v46 }
 0x344   :  { %1552 = vmatmul.mubr.f32.vlgmr.msra.gmra.mrb[18].mxu1 %v253_v47 }
 0x417   :  { %v1004_v55 = vpop.f32.mrb[18].mxu1 }
 0x418   :  { %v1005_v57 = vadd.f32 %v1004_v55, %v937_v54  ;;  %v1553_v20 = vpop.f32.mrb[19].mxu1 }
 0x41a   :  { %v1008_v22 = vmax.f32 %v1005_v57, 0.0 }
 0x41c   :  { %1587 = vmatmul.mubr.f32.vlgmr.msra.gmra.mrb[34].mxu0 %v1008_v22 }
 0x4ef   :  { %v1096_v56 = vpop.f32.mrb[34].mxu0 }
 0x4f0   :  { %v1097_v28 = vadd.f32 %v1096_v56, %v1029_v23  ;;  %v1588_v29 = vpop.f32.mrb[35].mxu0 }
 0x4f2   :  { %1100 = vst [vmem:[#allocation8] sm:$0x3] %v1097_v28 }
 0x4f3   :  { %1873 = shalt.err (!%p1870_p0)
}
 0x4f4   :  { %s1874_s25 = scalar_lea.hbm %s2097_s3, 32 }
 0x4f5   :  { %p1875_p1 = scmp.ne.s32.totalorder %s2097_s3, %s1874_s25  ;;  %p1878_p2 = scmp.lt.u32.totalorder %s1874_s25, %s2097_s3 }
 0x4f7   :  { %p1880_p3 = pnand %p1878_p2, %p1875_p1 }
 0x4f9   :  { %1883 = shalt.err (!%p1880_p3)
}
 0x4fa   :  { %1110 = dma.vmem_to_hbm [thread:$0]  %s1108_s21, 32, %s2097_s3, [#allocation4]  }
 0x4fb   :  { %1888 = dma.done.wait [#allocation4], 32  }
 0x4fc   :  { %1889 = vsyncadd [#allocation4], 4294967264 }
 0x4fd   :  { %1114 = vsyncpa [#allocation3], 1 }
 0x4fe   :  { %1115 = vsyncpa [#allocation6], 1 }
 0x4ff   :  { %1116 = vsyncpa [#allocation4], 1 }

</bundles_post_ra>
